<compile_context>
chip_gen: v6e
topology: v6e:2x2x1
jax: 0.10.0
libtpu: 0.0.40
codegen_flags: <defaults>
</compile_context>

<pallas_src>
import functools
import math

import jax
import jax.numpy as jnp
from jax.experimental import pallas as pl
from jax.experimental.pallas import tpu as pltpu

LABEL_PAD = -1  # padding value used in allowed_classes


def _round_up(x, m):
    return ((x + m - 1) // m) * m


def _selective_ls_kernel(epsilon, pred_ref, target_ref, allowed_ref, out_ref):
    pred = pred_ref[...].astype(jnp.float32)   # (TB, C); upcast on load (bf16 inputs ok)
    target = target_ref[...]                   # (TB, 1) int32 (-1 on padded rows)
    allowed = allowed_ref[...]                 # (TB, A) int32, LABEL_PAD-padded
    TB, C = pred.shape
    A = allowed.shape[1]

    # ---- small (TB, A) / (TB, 1) work: cheap, off the full-width hot path ----
    valid_slot = allowed != LABEL_PAD                                             # (TB, A)
    num_valid = jnp.sum(valid_slot.astype(jnp.float32), axis=1, keepdims=True)    # (TB, 1)
    safe_nv = jnp.maximum(num_valid, 1.0)                                         # guard padded rows

    # Is the target class among the (valid) allowed slots? (padded rows: target=-1
    # only matches invalid slots, which are filtered by valid_slot -> 0.)
    tgt_in_mask = jnp.max(((allowed == target) & valid_slot).astype(jnp.float32),
                          axis=1, keepdims=True)                                  # (TB, 1) in {0,1}
    tgt_present = ((target >= 0) & (target < C)).astype(jnp.float32)              # (TB, 1)

    # ---- full-width (TB, C) passes: keep the count minimal ----
    class_ids = jax.lax.broadcasted_iota(jnp.int32, (TB, C), dimension=1)

    # class_ids >= 0 and LABEL_PAD == -1, so padded slots can never match:
    # no valid_slot AND needed. Start the mask from slot 0 (no zeros tile).
    mask = class_ids == allowed[:, 0:1]
    for j in range(1, A):
        mask = mask | (class_ids == allowed[:, j:j + 1])

    is_target = class_ids == target

    # log_softmax pieces as per-row (TB, 1) constants: log_pred = pred - mlse.
    m = jnp.max(pred, axis=-1, keepdims=True)                                     # (TB, 1)
    lse = jnp.log(jnp.sum(jnp.exp(pred - m), axis=-1, keepdims=True))             # (TB, 1)
    mlse = m + lse                                                                # (TB, 1)

    # Row-wise masked sums of the raw logits; log_pred / kl never materialized.
    S_mask = jnp.sum(jnp.where(mask, pred, 0.0), axis=-1, keepdims=True)          # (TB, 1)
    N_mask = jnp.sum(mask.astype(jnp.float32), axis=-1, keepdims=True)            # (TB, 1) distinct allowed
    P_tgt = jnp.sum(jnp.where(is_target, pred, 0.0), axis=-1, keepdims=True)      # (TB, 1)

    # log_pred at the target class (0 when the row is padded: tgt_present == 0).
    lp_tgt = P_tgt - tgt_present * mlse                                           # (TB, 1)

    row_loss = jnp.zeros_like(safe_nv)
    if epsilon < 1.0:
        # Target-class term: (1-eps) * (log(1-eps) - log_pred[target]).
        log_t_tgt = jnp.float32(math.log(1.0 - epsilon))
        row_loss = row_loss + tgt_present * jnp.float32(1.0 - epsilon) * (log_t_tgt - lp_tgt)
    if epsilon > 0.0:
        # Allowed classes excluding the target (the target value overwrites it):
        # sum_c t*(log t - log_pred_c) = t * (count*log t - sum_c log_pred_c).
        count_excl = N_mask - tgt_in_mask                                         # (TB, 1)
        S_excl = (S_mask - tgt_in_mask * P_tgt) - count_excl * mlse               # sum log_pred over allowed\{tgt}
        t_allowed = jnp.float32(epsilon) / safe_nv                                # (TB, 1)
        log_t_allowed = jnp.float32(math.log(epsilon)) - jnp.log(safe_nv)         # (TB, 1)
        row_loss = row_loss + t_allowed * (count_excl * log_t_allowed - S_excl)

    # Per-tile partial sum, broadcast into an (8,128)-aligned output block so the
    # store is a full unmasked vst; the wrapper reads element [0,0] of each tile.
    out_ref[...] = jnp.full(out_ref.shape, jnp.sum(row_loss), dtype=jnp.float32)


def selective_label_smoothing_loss(pred, target, allowed_classes, epsilon=0.1):
    """pred: (B, C) float (f32 or bf16), target: (B,) int, allowed_classes: (B, A) int
    padded with LABEL_PAD. Returns scalar KL-div loss with reduction='batchmean'."""
    B, C = pred.shape
    A = allowed_classes.shape[1]

    itemsize = jnp.dtype(pred.dtype).itemsize

    # Derive tile budget from the device's VMEM: larger tiles on v5e/v6e
    # (128 MiB), conservative on v7x (64 MiB per TC).
    try:
        vmem_cap = int(pltpu.get_tpu_info().vmem_capacity_bytes)
    except Exception:
        vmem_cap = 64 * 1024 * 1024  # conservative fallback (v7x per-TC)
    vmem_limit = min((3 * vmem_cap) // 4, 96 * 1024 * 1024)

    # One pred buffer budget: double-buffered pred + ~a handful of live full-width
    # f32/bool temporaries (mask, is_target, exp, selects) must fit under the
    # scoped limit with headroom.
    live_fullwidth = 10
    budget = max(512 * 1024, (vmem_limit - (4 << 20)) // live_fullwidth)
    budget = min(budget, 8 * 1024 * 1024)

    tb = (budget // max(1, C * itemsize)) // 8 * 8
    tb = max(8, min(1024, tb))
    # TODO(synk): for very large C (big vocab) an 8-row tile can already exceed the
    # budget; that case needs class-axis tiling with an online-softmax two-pass.

    b8 = _round_up(B, 8)
    # Keep >=2 grid steps whenever possible so the "parallel" batch axis can
    # shard across both TensorCores on v7x.
    if b8 >= 16:
        tb = min(tb, max(8, (b8 // 2) // 8 * 8))
    tb = min(tb, b8)
    b_pad = _round_up(B, tb)
    num_tiles = b_pad // tb

    target = target.astype(jnp.int32)
    allowed = allowed_classes.astype(jnp.int32)
    if b_pad != B:
        # Padded rows contribute exactly 0: no allowed classes, target id never
        # matches any class index.
        pred = jnp.pad(pred, ((0, b_pad - B), (0, 0)))
        target = jnp.pad(target, (0, b_pad - B), constant_values=-1)
        allowed = jnp.pad(allowed, ((0, b_pad - B), (0, 0)),
                          constant_values=LABEL_PAD)
    target_2d = target.reshape(b_pad, 1)

    partials = pl.pallas_call(
        functools.partial(_selective_ls_kernel, float(epsilon)),
        out_shape=jax.ShapeDtypeStruct((num_tiles, 8, 128), jnp.float32),
        grid=(num_tiles,),
        in_specs=[
            pl.BlockSpec((tb, C), lambda i: (i, 0)),
            pl.BlockSpec((tb, 1), lambda i: (i, 0)),
            pl.BlockSpec((tb, A), lambda i: (i, 0)),
        ],
        out_specs=pl.BlockSpec((1, 8, 128), lambda i: (i, 0, 0)),
        compiler_params=pltpu.CompilerParams(
            dimension_semantics=("parallel",),      # shards tiles across TCs on v7x
            vmem_limit_bytes=int(vmem_limit),
        ),
    )(pred, target_2d, allowed)

    return jnp.sum(partials[:, 0, 0]) / jnp.float32(B)


def _reference(pred, target, allowed_classes, epsilon=0.1):
    """Plain-JAX reference mirroring the PyTorch module."""
    B, C = pred.shape
    class_ids = jnp.arange(C, dtype=jnp.int32)[None, :]
    valid_slot = allowed_classes != LABEL_PAD
    num_valid = jnp.sum(valid_slot, axis=1, keepdims=True).astype(jnp.float32)
    mask = jnp.any(
        (allowed_classes[:, :, None] == class_ids[:, None, :]) & valid_slot[:, :, None],
        axis=1)
    smoothed = jnp.where(mask, epsilon / num_valid, 0.0)
    smoothed = jnp.where(class_ids == target[:, None], 1.0 - epsilon, smoothed)
    log_pred = jax.nn.log_softmax(pred, axis=-1)
    kl = jnp.where(smoothed > 0, smoothed * (jnp.log(smoothed) - log_pred), 0.0)
    return jnp.sum(kl) / B


if __name__ == "__main__":
    key = jax.random.PRNGKey(0)
    B, C, A = 2, 32, 8
    epsilon = 0.1

    pred = jax.random.normal(key, (B, C), dtype=jnp.float32)
    allowed_classes = jnp.array(
        [[0, 3, 7, 12, LABEL_PAD, LABEL_PAD, LABEL_PAD, LABEL_PAD],
         [1, 5, 9, 20, 25, 31, LABEL_PAD, LABEL_PAD]],
        dtype=jnp.int32)
    target = jnp.array([3, 25], dtype=jnp.int32)

    loss = selective_label_smoothing_loss(pred, target, allowed_classes, epsilon)
    loss = jax.block_until_ready(loss)

    ref = _reference(pred, target, allowed_classes, epsilon)
    assert jnp.allclose(loss, ref, atol=1e-5, rtol=1e-5), (loss, ref)
    print("KERNEL_OK")
</pallas_src>

<mosaic_0001>
module attributes {stable_mosaic.version = 11 : i64} {
  func.func @_selective_ls_kernel(%arg0: i32, %arg1: memref<8x32xf32, #tpu.memory_space<vmem>>, %arg2: memref<8x1xi32, #tpu.memory_space<vmem>>, %arg3: memref<8x8xi32, #tpu.memory_space<vmem>>, %arg4: memref<1x8x128xf32, #tpu.memory_space<vmem>>) attributes {dimension_semantics = [#tpu.dimension_semantics<parallel>], iteration_bounds = array<i64: 1>, scalar_prefetch = 0 : i64, scratch_operands = 0 : i64, tpu.core_type = #tpu.core_type<tc>, window_params = [{transform_indices = @transform_0, window_bounds = array<i64: 8, 32>}, {transform_indices = @transform_1, window_bounds = array<i64: 8, 1>}, {transform_indices = @transform_2, window_bounds = array<i64: 8, 8>}, {transform_indices = @transform_3, window_bounds = array<i64: 1, 8, 128>}]} {
    %c0 = arith.constant 0 : index
    %c0_0 = arith.constant 0 : index
    %0 = vector.load %arg1[%c0, %c0_0] : memref<8x32xf32, #tpu.memory_space<vmem>>, vector<8x32xf32>
    %c0_1 = arith.constant 0 : index
    %c0_2 = arith.constant 0 : index
    %1 = vector.load %arg2[%c0_1, %c0_2] : memref<8x1xi32, #tpu.memory_space<vmem>>, vector<8x1xi32>
    %c0_3 = arith.constant 0 : index
    %c0_4 = arith.constant 0 : index
    %2 = vector.load %arg3[%c0_3, %c0_4] : memref<8x8xi32, #tpu.memory_space<vmem>>, vector<8x8xi32>
    %c-1_i32 = arith.constant -1 : i32
    %3 = vector.broadcast %c-1_i32 : i32 to vector<8x8xi32>
    %4 = arith.cmpi ne, %2, %3 : vector<8x8xi32>
    %5 = arith.extui %4 : vector<8x8xi1> to vector<8x8xi32>
    %6 = arith.sitofp %5 : vector<8x8xi32> to vector<8x8xf32>
    %cst = arith.constant dense<0.000000e+00> : vector<8xf32>
    %7 = vector.multi_reduction <add>, %6, %cst [1] : vector<8x8xf32> to vector<8xf32>
    %8 = vector.shape_cast %7 : vector<8xf32> to vector<8x1xf32>
    %cst_5 = arith.constant 1.000000e+00 : f32
    %9 = vector.broadcast %cst_5 : f32 to vector<8x1xf32>
    %10 = arith.maximumf %8, %9 : vector<8x1xf32>
    %11 = vector.broadcast %1 : vector<8x1xi32> to vector<8x8xi32>
    %12 = arith.cmpi eq, %2, %11 : vector<8x8xi32>
    %13 = arith.andi %12, %4 : vector<8x8xi1>
    %14 = arith.extui %13 : vector<8x8xi1> to vector<8x8xi32>
    %15 = arith.sitofp %14 : vector<8x8xi32> to vector<8x8xf32>
    %cst_6 = arith.constant dense<0xFF800000> : vector<8xf32>
    %16 = vector.multi_reduction <maximumf>, %15, %cst_6 [1] : vector<8x8xf32> to vector<8xf32>
    %17 = vector.shape_cast %16 : vector<8xf32> to vector<8x1xf32>
    %c0_i32 = arith.constant 0 : i32
    %18 = vector.broadcast %c0_i32 : i32 to vector<8x1xi32>
    %19 = arith.cmpi sge, %1, %18 : vector<8x1xi32>
    %c32_i32 = arith.constant 32 : i32
    %20 = vector.broadcast %c32_i32 : i32 to vector<8x1xi32>
    %21 = arith.cmpi slt, %1, %20 : vector<8x1xi32>
    %22 = arith.andi %19, %21 : vector<8x1xi1>
    %23 = arith.extui %22 : vector<8x1xi1> to vector<8x1xi32>
    %24 = arith.sitofp %23 : vector<8x1xi32> to vector<8x1xf32>
    %25 = tpu.iota {dimensions = array<i32: 1>} : vector<8x32xi32>
    %26 = vector.extract_strided_slice %2 {offsets = [0, 0], sizes = [8, 1], strides = [1, 1]} : vector<8x8xi32> to vector<8x1xi32>
    %27 = vector.broadcast %26 : vector<8x1xi32> to vector<8x32xi32>
    %28 = arith.cmpi eq, %25, %27 : vector<8x32xi32>
    %29 = vector.extract_strided_slice %2 {offsets = [0, 1], sizes = [8, 1], strides = [1, 1]} : vector<8x8xi32> to vector<8x1xi32>
    %30 = vector.broadcast %29 : vector<8x1xi32> to vector<8x32xi32>
    %31 = arith.cmpi eq, %25, %30 : vector<8x32xi32>
    %32 = arith.ori %28, %31 : vector<8x32xi1>
    %33 = vector.extract_strided_slice %2 {offsets = [0, 2], sizes = [8, 1], strides = [1, 1]} : vector<8x8xi32> to vector<8x1xi32>
    %34 = vector.broadcast %33 : vector<8x1xi32> to vector<8x32xi32>
    %35 = arith.cmpi eq, %25, %34 : vector<8x32xi32>
    %36 = arith.ori %32, %35 : vector<8x32xi1>
    %37 = vector.extract_strided_slice %2 {offsets = [0, 3], sizes = [8, 1], strides = [1, 1]} : vector<8x8xi32> to vector<8x1xi32>
    %38 = vector.broadcast %37 : vector<8x1xi32> to vector<8x32xi32>
    %39 = arith.cmpi eq, %25, %38 : vector<8x32xi32>
    %40 = arith.ori %36, %39 : vector<8x32xi1>
    %41 = vector.extract_strided_slice %2 {offsets = [0, 4], sizes = [8, 1], strides = [1, 1]} : vector<8x8xi32> to vector<8x1xi32>
    %42 = vector.broadcast %41 : vector<8x1xi32> to vector<8x32xi32>
    %43 = arith.cmpi eq, %25, %42 : vector<8x32xi32>
    %44 = arith.ori %40, %43 : vector<8x32xi1>
    %45 = vector.extract_strided_slice %2 {offsets = [0, 5], sizes = [8, 1], strides = [1, 1]} : vector<8x8xi32> to vector<8x1xi32>
    %46 = vector.broadcast %45 : vector<8x1xi32> to vector<8x32xi32>
    %47 = arith.cmpi eq, %25, %46 : vector<8x32xi32>
    %48 = arith.ori %44, %47 : vector<8x32xi1>
    %49 = vector.extract_strided_slice %2 {offsets = [0, 6], sizes = [8, 1], strides = [1, 1]} : vector<8x8xi32> to vector<8x1xi32>
    %50 = vector.broadcast %49 : vector<8x1xi32> to vector<8x32xi32>
    %51 = arith.cmpi eq, %25, %50 : vector<8x32xi32>
    %52 = arith.ori %48, %51 : vector<8x32xi1>
    %53 = vector.extract_strided_slice %2 {offsets = [0, 7], sizes = [8, 1], strides = [1, 1]} : vector<8x8xi32> to vector<8x1xi32>
    %54 = vector.broadcast %53 : vector<8x1xi32> to vector<8x32xi32>
    %55 = arith.cmpi eq, %25, %54 : vector<8x32xi32>
    %56 = arith.ori %52, %55 : vector<8x32xi1>
    %57 = vector.broadcast %1 : vector<8x1xi32> to vector<8x32xi32>
    %58 = arith.cmpi eq, %25, %57 : vector<8x32xi32>
    %cst_7 = arith.constant dense<0xFF800000> : vector<8xf32>
    %59 = vector.multi_reduction <maximumf>, %0, %cst_7 [1] : vector<8x32xf32> to vector<8xf32>
    %60 = vector.shape_cast %59 : vector<8xf32> to vector<8x1xf32>
    %61 = vector.broadcast %60 : vector<8x1xf32> to vector<8x32xf32>
    %62 = arith.subf %0, %61 : vector<8x32xf32>
    %63 = math.exp %62 : vector<8x32xf32>
    %cst_8 = arith.constant dense<0.000000e+00> : vector<8xf32>
    %64 = vector.multi_reduction <add>, %63, %cst_8 [1] : vector<8x32xf32> to vector<8xf32>
    %65 = vector.shape_cast %64 : vector<8xf32> to vector<8x1xf32>
    %66 = math.log %65 : vector<8x1xf32>
    %67 = arith.addf %60, %66 : vector<8x1xf32>
    %cst_9 = arith.constant 0.000000e+00 : f32
    %68 = vector.broadcast %cst_9 : f32 to vector<8x32xf32>
    %69 = arith.select %56, %0, %68 : vector<8x32xi1>, vector<8x32xf32>
    %cst_10 = arith.constant dense<0.000000e+00> : vector<8xf32>
    %70 = vector.multi_reduction <add>, %69, %cst_10 [1] : vector<8x32xf32> to vector<8xf32>
    %71 = vector.shape_cast %70 : vector<8xf32> to vector<8x1xf32>
    %72 = arith.extui %56 : vector<8x32xi1> to vector<8x32xi32>
    %73 = arith.sitofp %72 : vector<8x32xi32> to vector<8x32xf32>
    %cst_11 = arith.constant dense<0.000000e+00> : vector<8xf32>
    %74 = vector.multi_reduction <add>, %73, %cst_11 [1] : vector<8x32xf32> to vector<8xf32>
    %75 = vector.shape_cast %74 : vector<8xf32> to vector<8x1xf32>
    %cst_12 = arith.constant 0.000000e+00 : f32
    %76 = vector.broadcast %cst_12 : f32 to vector<8x32xf32>
    %77 = arith.select %58, %0, %76 : vector<8x32xi1>, vector<8x32xf32>
    %cst_13 = arith.constant dense<0.000000e+00> : vector<8xf32>
    %78 = vector.multi_reduction <add>, %77, %cst_13 [1] : vector<8x32xf32> to vector<8xf32>
    %79 = vector.shape_cast %78 : vector<8xf32> to vector<8x1xf32>
    %80 = arith.mulf %24, %67 : vector<8x1xf32>
    %81 = arith.subf %79, %80 : vector<8x1xf32>
    %cst_14 = arith.constant 0.000000e+00 : f32
    %82 = vector.broadcast %cst_14 : f32 to vector<8x1xf32>
    %cst_15 = arith.constant 0.899999976 : f32
    %83 = vector.broadcast %cst_15 : f32 to vector<8x1xf32>
    %84 = arith.mulf %24, %83 : vector<8x1xf32>
    %cst_16 = arith.constant -0.105360515 : f32
    %85 = vector.broadcast %cst_16 : f32 to vector<8x1xf32>
    %86 = arith.subf %85, %81 : vector<8x1xf32>
    %87 = arith.mulf %84, %86 : vector<8x1xf32>
    %88 = arith.addf %82, %87 : vector<8x1xf32>
    %89 = arith.subf %75, %17 : vector<8x1xf32>
    %90 = arith.mulf %17, %79 : vector<8x1xf32>
    %91 = arith.subf %71, %90 : vector<8x1xf32>
    %92 = arith.mulf %89, %67 : vector<8x1xf32>
    %93 = arith.subf %91, %92 : vector<8x1xf32>
    %cst_17 = arith.constant 1.000000e-01 : f32
    %94 = vector.broadcast %cst_17 : f32 to vector<8x1xf32>
    %95 = arith.divf %94, %10 : vector<8x1xf32>
    %96 = math.log %10 : vector<8x1xf32>
    %cst_18 = arith.constant -2.30258512 : f32
    %97 = vector.broadcast %cst_18 : f32 to vector<8x1xf32>
    %98 = arith.subf %97, %96 : vector<8x1xf32>
    %99 = arith.mulf %89, %98 : vector<8x1xf32>
    %100 = arith.subf %99, %93 : vector<8x1xf32>
    %101 = arith.mulf %95, %100 : vector<8x1xf32>
    %102 = arith.addf %88, %101 : vector<8x1xf32>
    %103 = vector.shape_cast %102 : vector<8x1xf32> to vector<1x8x1xf32>
    %cst_19 = arith.constant dense<0.000000e+00> : vector<1xf32>
    %104 = vector.multi_reduction <add>, %103, %cst_19 [1, 2] : vector<1x8x1xf32> to vector<1xf32>
    %105 = vector.shape_cast %104 : vector<1xf32> to vector<1x1x1xf32>
    %106 = vector.extract %105[0, 0, 0] : f32 from vector<1x1x1xf32>
    %107 = vector.broadcast %106 : f32 to vector<1x8x128xf32>
    %c0_20 = arith.constant 0 : index
    %c0_21 = arith.constant 0 : index
    %c0_22 = arith.constant 0 : index
    %108 = vector.load %arg4[%c0_20, %c0_21, %c0_22] : memref<1x8x128xf32, #tpu.memory_space<vmem>>, vector<1x8x128xf32>
    tpu.vector_store %arg4[%c0_20, %c0_21, %c0_22], %107 {strides = array<i32>} : memref<1x8x128xf32, #tpu.memory_space<vmem>>, vector<1x8x128xf32>,
    return
  }
  func.func @transform_0(%arg0: i32) -> (i32, i32) {
    %c0_i32 = arith.constant 0 : i32
    %c0_i32_0 = arith.constant 0 : i32
    return %arg0, %c0_i32 : i32, i32
  }
  func.func @transform_1(%arg0: i32) -> (i32, i32) {
    %c0_i32 = arith.constant 0 : i32
    %c0_i32_0 = arith.constant 0 : i32
    return %arg0, %c0_i32 : i32, i32
  }
  func.func @transform_2(%arg0: i32) -> (i32, i32) {
    %c0_i32 = arith.constant 0 : i32
    %c0_i32_0 = arith.constant 0 : i32
    return %arg0, %c0_i32 : i32, i32
  }
  func.func @transform_3(%arg0: i32) -> (i32, i32, i32) {
    %c0_i32 = arith.constant 0 : i32
    %c0_i32_0 = arith.constant 0 : i32
    %c0_i32_1 = arith.constant 0 : i32
    return %arg0, %c0_i32, %c0_i32_0 : i32, i32, i32
  }
}

</mosaic_0001>

<bundles_post_ra>
// kernel: tpu_custom_call.1
= control target key start
LH: loop header
LB: loop body
LE: loop exit
PB: predicated region body
PF: predicated region fallthrough
CT: control target
= control target key end

     0   :  { %8 = vsyncpa [#allocation3], 0  ;;  %s319_s0 = inlined_call_operand.vmem [shape: f32[8,32], index: 0, kind: input, shape index: {}]   ;;  %s320_s1 = inlined_call_operand.vmem [shape: s32[8,1], index: 1, kind: input, shape index: {}]   ;;  %s321_s2 = inlined_call_operand.hbm [shape: s32[8,8], index: 2, kind: input, shape index: {}]   ;;  %s322_s3 = inlined_call_operand.hbm [shape: f32[1,8,128], index: 3, kind: output, shape index: {}]  }
   0x1   :  { %9 = vsyncpa [#allocation4], 0  ;;  %s248_s12 = smov [#allocation2]  }
   0x2   :  { %s20_s13 = sshll.u32 %s248_s12, 4  ;;  %s21_s13 = int_to_ptr.vmem [resolvable:$true] %s20_s13 }
   0x3   :  { %s212_s14 = scalar_lea.vmem %s21_s13, 128  ;;  %p217_p1 = scmp.lt.s32.totalorder %s21_s13, %s21_s13 }
   0x4   :  { %p213_p0 = scmp.ne.s32.totalorder %s21_s13, %s212_s14  ;;  %p218_p2 = scmp.lt.s32.totalorder %s212_s14, %s212_s14 }
   0x6   :  { %p219_p3 = por %p218_p2, %p217_p1 }
   0x8   :  { %p220_p4 = pnand %p219_p3, %p213_p0 }
   0xa   :  { %223 = shalt.err (!%p220_p4)
}
   0xb   :  { %23 = dma.hbm_to_vmem [thread:$0]  %s321_s2, 128, %s21_s13, [#allocation3]  }
   0xc   :  { %244 = dma.done.wait [#allocation3], 128  }
   0xd   :  { %245 = vsyncadd [#allocation3], 4294967168  ;;  %v249_v0 = vmov 1   ;;  %v250_v1 = vmov 0   ;;  %vm95_vm0 = vcmask 261120   ;;  %v29_v2 = vld [vmem:[#allocation2] sm:$0xff]  ;;  %v53_v20 = vlaneseq }
   0xe   :  { %187 = vset.pattern.permute.xlu1 %v249_v0  ;;  %186 = vset.pattern.permute.xlu0 %v250_v1  ;;  %v285_v3 = vld [vmem:[%s319_s0] sm:$0xff]  ;;  %v251_v5 = vmov 2   ;;  %v252_v6 = vmov 3   ;;  %v253_v7 = vmov 4   ;;  %v254_v8 = vmov 5  }
   0xf   :  { %60 = vperm.xlu1 %187, %v29_v2   ;;  %v96_v4 = vsel %vm95_vm0, %v285_v3, -inf  ;;  %v255_v9 = vmov 6   ;;  %v292_v10 = vld [vmem:[%s320_s1] sm:$0xff]  ;;  %v256_v11 = vmov 7   ;;  %vm30_vm1 = vcmp.ne.s32.totalorder %v29_v2, 4294967295  ;;  %s258_s1 = smov [#allocation5]  }
  0x10   :  { %97 = vmax.xlane.f32.xlu0 %v96_v4  ;;  %v257_v12 = vmov 0.0   ;;  %vm323_vm2 = vcmask 64512   ;;  %v54_v23 = vand.u32 127, %v53_v20  ;;  %s160_s19 = sshll.u32 %s258_s1, 4  ;;  %s161_s19 = int_to_ptr.vmem [resolvable:$true] %s160_s19 }
  0x11   :  { %v169_v13 = vsel %vm30_vm1, 1.0, %v257_v12  ;;  %s224_s21 = scalar_lea.vmem %s161_s19, 128  ;;  %p229_p6 = scmp.lt.s32.totalorder %s161_s19, %s161_s19 }
  0x12   :  { %v34_v14 = vsel %vm323_vm2, %v169_v13, 0.0  ;;  %p225_p5 = scmp.ne.s32.totalorder %s161_s19, %s224_s21  ;;  %p230_p7 = scmp.lt.s32.totalorder %s224_s21, %s224_s21 }
  0x13   :  { %188 = vset.pattern.permute.xlu1 %v251_v5 }
  0x14   :  { %65 = vperm.xlu1 %188, %v29_v2   ;;  %p231_p8 = por %p230_p7, %p229_p6 }
  0x16   :  { %p232_p9 = pnand %p231_p8, %p225_p5 }
  0x18   :  { %189 = vset.pattern.permute.xlu1 %v252_v6 }
  0x19   :  { %70 = vperm.xlu1 %189, %v29_v2  }
  0x1d   :  { %190 = vset.pattern.permute.xlu1 %v253_v7 }
  0x1e   :  { %75 = vperm.xlu1 %190, %v29_v2  }
  0x22   :  { %191 = vset.pattern.permute.xlu1 %v254_v8 }
  0x23   :  { %80 = vperm.xlu1 %191, %v29_v2  }
  0x26   :  { %56 = vperm.xlu0 %186, %v29_v2  }
  0x27   :  { %192 = vset.pattern.permute.xlu1 %v255_v9 }
  0x28   :  { %85 = vperm.xlu1 %192, %v29_v2  }
  0x2a   :  { %195 = vset.pattern.permute.xlu0 %v256_v11 }
  0x2c   :  { %193 = vset.pattern.permute.xlu1 %v250_v1 }
  0x2d   :  { %39 = vperm.xlu1 %193, %v292_v10  }
  0x31   :  { %194 = vset.pattern.permute.xlu1 %v256_v11 }
  0x32   :  { %90 = vperm.xlu1 %194, %v29_v2  }
  0x56   :  { %35 = vadd.xlane.f32.xlu1 %v34_v14 }
  0x8a   :  { %v61_v15 = vpop.permute.xlu1 %60 }
  0x8b   :  { %vm62_vm3 = vcmp.eq.s32.totalorder %v54_v23, %v61_v15 }
  0x8f   :  { %v66_v16 = vpop.permute.xlu1 %65 }
  0x90   :  { %vm67_vm5 = vcmp.eq.s32.totalorder %v54_v23, %v66_v16 }
  0x94   :  { %v71_v17 = vpop.permute.xlu1 %70 }
  0x95   :  { %vm72_vm7 = vcmp.eq.s32.totalorder %v54_v23, %v71_v17 }
  0x99   :  { %v298_v18 = vpop.xlane.xlu0 %97  ;;  %v76_v19 = vpop.permute.xlu1 %75 }
  0x9a   :  { %v99_v21 = vsub.f32 %v285_v3, %v298_v18  ;;  %vm77_vm10 = vcmp.eq.s32.totalorder %v54_v23, %v76_v19 }
  0x9c   :  { %v100_v22 = vmul.f32 1.442695, %v99_v21 }
  0x9e   :  { %196 = vpow2.f32 %v100_v22  ;;  %v81_v24 = vpop.permute.xlu1 %80 }
  0x9f   :  { %vm82_vm11 = vcmp.eq.s32.totalorder %v54_v23, %v81_v24 }
  0xa1   :  { %v57_v25 = vpop.permute.xlu0 %56 }
  0xa2   :  { %vm58_vm4 = vcmp.eq.s32.totalorder %v54_v23, %v57_v25 }
  0xa3   :  { %vm63_vm6 = vmor %vm58_vm4, %vm62_vm3  ;;  %v86_v26 = vpop.permute.xlu1 %85  ;;  %vm324_vm3 = vcmask 64512  }
  0xa4   :  { %vm68_vm8 = vmor %vm63_vm6, %vm67_vm5  ;;  %vm87_vm2 = vcmp.eq.s32.totalorder %v54_v23, %v86_v26 }
  0xa5   :  { %vm73_vm9 = vmor %vm68_vm8, %vm72_vm7 }
  0xa6   :  { %vm78_vm12 = vmor %vm73_vm9, %vm77_vm10 }
  0xa7   :  { %vm83_vm15 = vmor %vm78_vm12, %vm82_vm11 }
  0xa8   :  { %v40_v27 = vpop.permute.xlu1 %39  ;;  %vm88_vm4 = vmor %vm83_vm15, %vm87_vm2  ;;  %vm49_vm2 = vcmp.lt.s32.totalorder %v292_v10, 32 }
  0xa9   :  { %vm41_vm13 = vcmp.eq.s32.totalorder %v29_v2, %v40_v27  ;;  %vm94_vm6 = vcmp.eq.s32.totalorder %v54_v23, %v40_v27 }
  0xaa   :  { %vm42_vm14 = vmand %vm41_vm13, %vm30_vm1  ;;  %v117_v37 = vsel %vm94_vm6, %v285_v3, 0.0  ;;  %vm48_vm1 = vcmp.ge.s32.totalorder %v292_v10, 0 }
  0xab   :  { %v197_v28 = vpop.eup %196  ;;  %v170_v29 = vsel %vm42_vm14, 1.0, %v257_v12  ;;  %v118_v38 = vsel %vm95_vm0, %v117_v37, 0.0  ;;  %vm50_vm8 = vmand %vm48_vm1, %vm49_vm2 }
  0xac   :  { %v102_v30 = vsel %vm95_vm0, %v197_v28, 0.0  ;;  %v45_v31 = vsel %vm324_vm3, %v170_v29, -inf  ;;  %v171_v50 = vsel %vm50_vm8, 1.0, %v257_v12 }
  0xad   :  { %v91_v32 = vpop.permute.xlu1 %90  ;;  %103 = vadd.xlane.f32.xlu0 %v102_v30  ;;  %46 = vmax.xlane.f32.xlu1 %v45_v31  ;;  %v123_v60 = vmul.f32 0.9, %v171_v50 }
  0xae   :  { %vm92_vm5 = vcmp.eq.s32.totalorder %v54_v23, %v91_v32 }
  0xaf   :  { %vm93_vm7 = vmor %vm88_vm4, %vm92_vm5 }
  0xb0   :  { %v172_v33 = vsel %vm93_vm7, 1.0, %v257_v12  ;;  %v108_v34 = vsel %vm93_vm7, %v285_v3, 0.0 }
  0xb1   :  { %v114_v35 = vsel %vm95_vm0, %v172_v33, 0.0  ;;  %v109_v36 = vsel %vm95_vm0, %v108_v34, 0.0  ;;  %vm141_vm0 = vcmask 7168  }
  0xb2   :  { %115 = vadd.xlane.f32.xlu1 %v114_v35  ;;  %110 = vadd.xlane.f32.xlu0 %v109_v36 }
  0xb6   :  { %119 = vadd.xlane.f32.xlu1 %v118_v38 }
  0xdf   :  { %v36_v39 = vpop.xlane.xlu1 %35 }
  0xe0   :  { %v37_v40 = vmax.f32 %v36_v39, 1.0 }
  0xe2   :  { %198 = vlog2.f32 %v37_v40 }
  0xef   :  { %v199_v44 = vpop.eup %198 }
  0xf0   :  { %v135_v46 = vmul.f32 0.6931472, %v199_v44 }
  0xf2   :  { %v136_v51 = vsub.f32 -2.3025851, %v135_v46 }
 0x136   :  { %v104_v41 = vpop.xlane.xlu0 %103  ;;  %v47_v42 = vpop.xlane.xlu1 %46 }
 0x137   :  { %200 = vlog2.f32 %v104_v41 }
 0x138   :  { %202 = vrcp.f32 %v37_v40 }
 0x13b   :  { %v116_v43 = vpop.xlane.xlu1 %115  ;;  %v111_v54 = vpop.xlane.xlu0 %110 }
 0x13c   :  { %v127_v53 = vsub.f32 %v116_v43, %v47_v42 }
 0x13e   :  { %v137_v59 = vmul.f32 %v136_v51, %v127_v53 }
 0x13f   :  { %v120_v45 = vpop.xlane.xlu1 %119 }
 0x140   :  { %v128_v49 = vmul.f32 %v120_v45, %v47_v42 }
 0x142   :  { %v129_v57 = vsub.f32 %v111_v54, %v128_v49 }
 0x144   :  { %v201_v47 = vpop.eup %200 }
 0x145   :  { %v106_v48 = vmul.f32 0.6931472, %v201_v47  ;;  %v203_v58 = vpop.eup %202 }
 0x146   :  { %v133_v63 = vmul.f32 0.1, %v203_v58 }
 0x147   :  { %v107_v52 = vadd.f32 %v106_v48, %v298_v18 }
 0x149   :  { %v130_v55 = vmul.f32 %v127_v53, %v107_v52  ;;  %v121_v56 = vmul.f32 %v171_v50, %v107_v52 }
 0x14b   :  { %v122_v61 = vsub.f32 %v120_v45, %v121_v56  ;;  %v131_v62 = vsub.f32 %v129_v57, %v130_v55 }
 0x14d   :  { %v124_v0 = vsub.f32 -0.105360515, %v122_v61  ;;  %v138_v1 = vsub.f32 %v137_v59, %v131_v62 }
 0x14f   :  { %v125_v2 = vmul.f32 %v124_v0, %v123_v60  ;;  %v139_v3 = vmul.f32 %v138_v1, %v133_v63 }
 0x151   :  { %v140_v4 = vadd.f32 %v139_v3, %v125_v2 }
 0x153   :  { %v142_v5 = vsel %vm141_vm0, %v140_v4, 0.0 }
 0x154   :  { %143 = vadd.xlane.f32.xlu1 %v142_v5 }
 0x1dd   :  { %v144_v6 = vpop.xlane.xlu1 %143 }
 0x1de   :  { %v145_v7 = vrot.slane %v144_v6, 4 }
 0x1e0   :  { %v146_v8 = vadd.f32 %v145_v7, %v144_v6 }
 0x1e2   :  { %v147_v9 = vrot.slane %v146_v8, 2 }
 0x1e4   :  { %v148_v10 = vadd.f32 %v147_v9, %v146_v8 }
 0x1e6   :  { %v149_v11 = vrot.slane %v148_v10, 1 }
 0x1e8   :  { %v150_v12 = vadd.f32 %v149_v11, %v148_v10 }
 0x1ea   :  { %173 = vpush %v150_v12 }
 0x21b   :  { %s174_s20 = spop %173 }
 0x21c   :  { %v152_v13 = vstv %s174_s20 }
 0x21d   :  { %153 = vst [vmem:[#allocation5] sm:$0xff] %v152_v13 }
 0x21e   :  { %235 = shalt.err (!%p232_p9)
}
 0x21f   :  { %163 = dma.vmem_to_hbm [thread:$0]  %s161_s19, 128, %s322_s3, [#allocation4]  }
 0x220   :  { %246 = dma.done.wait [#allocation4], 128  }
 0x221   :  { %247 = vsyncadd [#allocation4], 4294967168 }
 0x222   :  { %167 = vsyncpa [#allocation3], 1 }
 0x223   :  { %168 = vsyncpa [#allocation4], 1 }

</bundles_post_ra>
